<compile_context>
chip_gen: v7x
topology: tpu7x:2x2x1
jax: 0.10.0
libtpu: 0.0.40
codegen_flags: <defaults>
</compile_context>

<pallas_src>
import numpy as np
import jax
import jax.numpy as jnp
from jax.experimental import pallas as pl
from jax.experimental.pallas import tpu as pltpu

_VMEM_LIMIT_BYTES = 32 * 1024 * 1024   # explicit scoped-VMEM limit, safe on v5e/v6e/v7x


def _round_up(n, m):
    return ((n + m - 1) // m) * m


# ---------------------------------------------------------------------------
# Pass 1: child-domain kernel (scatter + forget gate), grid over child tiles.
# ---------------------------------------------------------------------------
def _child_kernel(r_ref, hc_ref, g_ref, x_ref, w_fx_ref, w_fh_ref, b_fh_ref,
                  hfc_ref):
    H = w_fh_ref.shape[1]
    bf16 = jnp.bfloat16
    f32 = jnp.float32

    # replace_idx_ (+ hx broadcast): R is 0/1 in f32 -> exact scatter; c stays f32.
    hc_full = jnp.dot(r_ref[...], hc_ref[...], preferred_element_type=f32)
    h_full = hc_full[:, :H]
    c_full = hc_full[:, H:]

    # repeat_idx_(fx(x), tree_idx): gather this tile's parent embeddings with the
    # host-built one-hot G (no in-kernel transpose of S), then apply w_fx.
    xg = jnp.dot(g_ref[...], x_ref[...], preferred_element_type=f32)
    fx = jnp.dot(xg.astype(bf16), w_fx_ref[...], preferred_element_type=f32)

    f = jax.nn.sigmoid(
        jnp.dot(h_full.astype(bf16), w_fh_ref[...], preferred_element_type=f32)
        + b_fh_ref[...] + fx)

    # Two lane-aligned (H = multiple of 128) half stores, no concat temporary.
    hfc_ref[:, :H] = h_full
    hfc_ref[:, H:] = f * c_full


# ---------------------------------------------------------------------------
# Pass 2: parent-domain kernel (block segment-sum + gates),
#         grid = (parent tiles "parallel", child tiles "arbitrary").
# ---------------------------------------------------------------------------
def _parent_kernel(x_ref, w_ioux_ref, w_iouh_ref, b_iouh_ref, s_ref, hfc_ref,
                   h_out_ref, c_out_ref, acc_ref):
    H = h_out_ref.shape[1]
    bf16 = jnp.bfloat16
    f32 = jnp.float32
    k = pl.program_id(1)

    @pl.when(k == 0)
    def _():
        acc_ref[...] = jnp.zeros_like(acc_ref)

    # sum_idx_ of [h_full | f*c]: one fused 2H-wide block matmul per child tile.
    # S is 0/1 in f32 so the recurrent c path keeps f32 precision.
    acc_ref[...] += jnp.dot(s_ref[...], hfc_ref[...], preferred_element_type=f32)

    @pl.when(k == pl.num_programs(1) - 1)
    def _():
        acc = acc_ref[...]
        h_sum = acc[:, :H]
        fc_sum = acc[:, H:]
        iou = (jnp.dot(x_ref[...], w_ioux_ref[...], preferred_element_type=f32)
               + jnp.dot(h_sum.astype(bf16), w_iouh_ref[...],
                         preferred_element_type=f32)
               + b_iouh_ref[...])
        i = jax.nn.sigmoid(iou[:, :H])
        o = jax.nn.sigmoid(iou[:, H:2 * H])
        u = jnp.tanh(iou[:, 2 * H:])
        c_new = i * u + fc_sum
        h_out_ref[...] = (o * jnp.tanh(c_new)).astype(h_out_ref.dtype)  # bf16 h
        c_out_ref[...] = c_new                                          # f32 c


# ---------------------------------------------------------------------------
# Host-side wrappers.
# ---------------------------------------------------------------------------
def prepare_params(params):
    """Pad / cast the cell weights ONCE (hoisted out of the per-level hot path)."""
    E = params["w_ioux"].shape[0]
    H = params["w_fh"].shape[1]
    if H % 128 != 0:
        # Lane-aligned slicing of the fused iou / [h_full|fc] slabs relies on this.
        raise ValueError(f"hidden_size must be a multiple of 128 (got {H}).")
    e_p = _round_up(E, 128)
    pad_e = ((0, e_p - E), (0, 0))
    f32, bf16 = jnp.float32, jnp.bfloat16
    return {
        "E": E, "H": H, "e_p": e_p,
        "w_ioux": jnp.pad(jnp.asarray(params["w_ioux"], f32), pad_e).astype(bf16),
        "w_fx": jnp.pad(jnp.asarray(params["w_fx"], f32), pad_e).astype(bf16),
        "w_iouh": jnp.asarray(params["w_iouh"], bf16),
        "w_fh": jnp.asarray(params["w_fh"], bf16),
        "b_iouh": jnp.asarray(params["b_iouh"], f32),
        "b_fh": jnp.asarray(params["b_fh"], f32),
    }


def child_sum_tree_lstm_cell(prepped, x, h, c, hx0, hx1, tree_idx, hidden_idx,
                             *, tp=256, tck=512):
    """ChildSumTreeLSTMCell.forward via two tiled Pallas kernels.

    tree_idx / hidden_idx are host-side (numpy) structural metadata; the 0/1
    scatter / gather / segment matrices are built on the host once, so there is
    NO device->host sync in the hot path.  Batch several trees (or a whole tree
    level) into one call so the (tp x tck) tiles are full.  Segments follow
    torch.unique_consecutive semantics; the fx gather follows index_select with
    the raw tree_idx values, exactly as in the module.
    """
    E, H, e_p = prepped["E"], prepped["H"], prepped["e_p"]
    f32, bf16 = jnp.float32, jnp.bfloat16

    tree_idx = np.asarray(tree_idx, dtype=np.int64)
    hidden_idx = np.asarray(hidden_idx, dtype=np.int64)
    num_children = int(tree_idx.shape[0])
    num_hidden = int(hidden_idx.shape[0])
    num_parents = int(x.shape[0])          # trust x; do not infer from tree_idx
    if num_children == 0:
        raise ValueError("tree_idx must be non-empty (no children to reduce).")
    if num_hidden and np.unique(hidden_idx).shape[0] != num_hidden:
        # index_copy keeps the last write; a matmul scatter would sum duplicates.
        raise ValueError("hidden_idx must not contain duplicate entries.")
    if tree_idx.min() < 0 or tree_idx.max() >= num_parents:
        raise ValueError("tree_idx entries must index rows of x.")
    # Faithful to torch.unique_consecutive: segments are consecutive runs.
    seg_id = np.cumsum(np.r_[True, tree_idx[1:] != tree_idx[:-1]]) - 1
    if int(seg_id[-1]) + 1 != num_parents:
        raise ValueError("number of consecutive tree_idx groups must equal x.shape[0].")

    # Tile sizes: parent tile multiple of 8 (sublanes), child tile multiple of
    # 128 (lane axis of the S blocks).  Defaults sized for v6e/v7x; shrink tp to
    # ~128 on v5e if VMEM-pressured.
    tp = _round_up(min(tp, _round_up(num_parents, 8)), 8)
    tck = _round_up(min(tck, _round_up(num_children, 128)), 128)
    np_p = _round_up(num_parents, tp)
    nc_p = _round_up(num_children, tck)
    nh1_p = _round_up(num_hidden + 1, 8)     # +1 row carries [hx0 | hx1]
    n_pt = np_p // tp
    n_ct = nc_p // tck

    # Host-built 0/1 structure matrices (exact in f32 / bf16).
    S = np.zeros((np_p, nc_p), np.float32)              # sum_idx_   (segment sum)
    S[seg_id, np.arange(num_children)] = 1.0
    G = np.zeros((nc_p, np_p), np.float32)              # repeat_idx_ (gather)
    G[np.arange(num_children), tree_idx] = 1.0
    R = np.zeros((nc_p, nh1_p), np.float32)              # replace_idx_ (+ hx bcast)
    if num_hidden:
        R[hidden_idx, np.arange(num_hidden)] = 1.0
    in_hidden = np.zeros(nc_p, np.bool_)
    in_hidden[hidden_idx] = True
    R[np.arange(num_children), num_hidden] = (~in_hidden[:num_children]).astype(np.float32)

    hc_aug = jnp.concatenate(
        [jnp.concatenate([jnp.asarray(h, f32), jnp.asarray(c, f32)], axis=-1),
         jnp.concatenate([jnp.asarray(hx0, f32), jnp.asarray(hx1, f32)], axis=-1)],
        axis=0)                                          # (num_hidden+1, 2H) f32
    hc_aug = jnp.pad(hc_aug, ((0, nh1_p - (num_hidden + 1)), (0, 0)))
    x_p = jnp.pad(jnp.asarray(x, f32),
                  ((0, np_p - num_parents), (0, e_p - E))).astype(bf16)

    cparams_child = pltpu.CompilerParams(
        dimension_semantics=("parallel",), vmem_limit_bytes=_VMEM_LIMIT_BYTES)
    cparams_parent = pltpu.CompilerParams(
        dimension_semantics=("parallel", "arbitrary"),
        vmem_limit_bytes=_VMEM_LIMIT_BYTES)

    # ---- Pass 1: per-child slab [h_full | f*c_full] --------------------------
    hfc = pl.pallas_call(
        _child_kernel,
        out_shape=jax.ShapeDtypeStruct((nc_p, 2 * H), f32),
        grid_spec=pltpu.PrefetchScalarGridSpec(
            num_scalar_prefetch=0,
            grid=(n_ct,),
            in_specs=[
                pl.BlockSpec((tck, nh1_p), lambda j: (j, 0)),      # R tile
                pl.BlockSpec((nh1_p, 2 * H), lambda j: (0, 0)),    # [h|c|hx] resident
                pl.BlockSpec((tck, np_p), lambda j: (j, 0)),       # G tile
                pl.BlockSpec((np_p, e_p), lambda j: (0, 0)),       # x resident
                pl.BlockSpec((e_p, H), lambda j: (0, 0)),          # w_fx resident
                pl.BlockSpec((H, H), lambda j: (0, 0)),            # w_fh resident
                pl.BlockSpec((1, H), lambda j: (0, 0)),            # b_fh resident
            ],
            out_specs=pl.BlockSpec((tck, 2 * H), lambda j: (j, 0)),
        ),
        compiler_params=cparams_child,
    )(jnp.asarray(R, f32), hc_aug, jnp.asarray(G, bf16), x_p,
      prepped["w_fx"], prepped["w_fh"], prepped["b_fh"])

    # ---- Pass 2: block segment-sum + gates, accumulated over child tiles -----
    h_out, c_out = pl.pallas_call(
        _parent_kernel,
        out_shape=(jax.ShapeDtypeStruct((np_p, H), bf16),
                   jax.ShapeDtypeStruct((np_p, H), f32)),
        grid_spec=pltpu.PrefetchScalarGridSpec(
            num_scalar_prefetch=0,
            grid=(n_pt, n_ct),
            in_specs=[
                pl.BlockSpec((tp, e_p), lambda i, k: (i, 0)),      # x tile
                pl.BlockSpec((e_p, 3 * H), lambda i, k: (0, 0)),   # w_ioux resident
                pl.BlockSpec((H, 3 * H), lambda i, k: (0, 0)),     # w_iouh resident
                pl.BlockSpec((1, 3 * H), lambda i, k: (0, 0)),     # b_iouh resident
                pl.BlockSpec((tp, tck), lambda i, k: (i, k)),      # S block
                pl.BlockSpec((tck, 2 * H), lambda i, k: (k, 0)),   # [h_full|fc] block
            ],
            out_specs=(pl.BlockSpec((tp, H), lambda i, k: (i, 0)),
                       pl.BlockSpec((tp, H), lambda i, k: (i, 0))),
            scratch_shapes=[pltpu.VMEM((tp, 2 * H), jnp.float32)],
        ),
        compiler_params=cparams_parent,
    )(x_p, prepped["w_ioux"], prepped["w_iouh"], prepped["b_iouh"],
      jnp.asarray(S, f32), hfc)

    return h_out[:num_parents], c_out[:num_parents]


# ---------------------------------------------------------------------------
# Pure-JAX f32 reproduction of the PyTorch forward (verification only).
# ---------------------------------------------------------------------------
def reference_forward(params, x, h, c, hx0, hx1, tree_idx, hidden_idx):
    tree_idx = np.asarray(tree_idx)
    hidden_idx = np.asarray(hidden_idx)
    nc = tree_idx.shape[0]
    seg_id = np.cumsum(np.r_[True, tree_idx[1:] != tree_idx[:-1]]) - 1
    nseg = int(seg_id[-1]) + 1
    H = params["w_fh"].shape[1]
    h_full = jnp.tile(hx0, (nc, 1)).at[hidden_idx].set(h)
    c_full = jnp.tile(hx1, (nc, 1)).at[hidden_idx].set(c)
    h_sum = jnp.zeros((nseg, H), jnp.float32).at[seg_id].add(h_full)
    iou = x @ params["w_ioux"] + h_sum @ params["w_iouh"] + params["b_iouh"]
    i, o, u = iou[:, :H], iou[:, H:2 * H], iou[:, 2 * H:]
    i, o, u = jax.nn.sigmoid(i), jax.nn.sigmoid(o), jnp.tanh(u)
    f = jax.nn.sigmoid(h_full @ params["w_fh"] + params["b_fh"]
                       + (x @ params["w_fx"])[tree_idx])
    fc = f * c_full
    c_new = i * u + jnp.zeros((nseg, H), jnp.float32).at[seg_id].add(fc)
    h_new = o * jnp.tanh(c_new)
    return h_new, c_new


if __name__ == "__main__":
    embedding_size = 64
    hidden_size = 128

    # A whole forest level batched into ONE call (perf review: batch so the MXU
    # M-dims are real): 40 parent nodes with 2..6 children each -> 160 children.
    num_parents = 40
    counts = (np.arange(num_parents) % 5) + 2
    tree_idx = np.repeat(np.arange(num_parents), counts).astype(np.int32)
    num_children = int(tree_idx.shape[0])                 # 160
    hidden_idx = np.arange(0, num_children, 3, dtype=np.int32)  # children with state
    num_hidden = int(hidden_idx.shape[0])                 # 54

    key = jax.random.PRNGKey(0)
    keys = jax.random.split(key, 12)

    # nn.Linear weights stored transposed so the kernels compute x @ W.
    params = {
        "w_ioux": jax.random.normal(keys[0], (embedding_size, 3 * hidden_size),
                                    jnp.float32) * 0.05,
        "w_iouh": jax.random.normal(keys[1], (hidden_size, 3 * hidden_size),
                                    jnp.float32) * 0.05,
        "b_iouh": jax.random.normal(keys[2], (1, 3 * hidden_size),
                                    jnp.float32) * 0.05,
        "w_fx": jax.random.normal(keys[3], (embedding_size, hidden_size),
                                  jnp.float32) * 0.05,
        "w_fh": jax.random.normal(keys[4], (hidden_size, hidden_size),
                                  jnp.float32) * 0.05,
        "b_fh": jax.random.normal(keys[5], (1, hidden_size),
                                  jnp.float32) * 0.05,
    }

    x = jax.random.normal(keys[6], (num_parents, embedding_size), jnp.float32)
    h = jax.random.normal(keys[7], (num_hidden, hidden_size), jnp.float32)
    c = jax.random.normal(keys[8], (num_hidden, hidden_size), jnp.float32)
    hx0 = jax.random.normal(keys[9], (1, hidden_size), jnp.float32)
    hx1 = jax.random.normal(keys[10], (1, hidden_size), jnp.float32)

    prepped = prepare_params(params)   # weight pad/cast hoisted out of hot path

    # Small tiles here purely to exercise the multi-tile grid (3 parent tiles x
    # 2 child tiles) at demo sizes; production defaults are tp=256 / tck=512.
    h_new, c_new = child_sum_tree_lstm_cell(
        prepped, x, h, c, hx0, hx1, tree_idx, hidden_idx, tp=16, tck=128)
    jax.block_until_ready((h_new, c_new))

    h_ref, c_ref = reference_forward(params, x, h, c, hx0, hx1,
                                     tree_idx, hidden_idx)
    # bf16 weight matmuls (f32 accumulation) + bf16 h output -> loosened tolerance.
    assert np.allclose(np.asarray(h_new, np.float32), np.asarray(h_ref),
                       atol=3e-2, rtol=3e-2)
    assert np.allclose(np.asarray(c_new), np.asarray(c_ref),
                       atol=3e-2, rtol=3e-2)

    print("KERNEL_OK")
</pallas_src>

<mosaic_0001>
module attributes {stable_mosaic.version = 11 : i64} {
  func.func @_child_kernel(%arg0: i32, %arg1: memref<128x56xf32, #tpu.memory_space<vmem>>, %arg2: memref<56x256xf32, #tpu.memory_space<vmem>>, %arg3: memref<128x48xbf16, #tpu.memory_space<vmem>>, %arg4: memref<48x128xbf16, #tpu.memory_space<vmem>>, %arg5: memref<128x128xbf16, #tpu.memory_space<vmem>>, %arg6: memref<128x128xbf16, #tpu.memory_space<vmem>>, %arg7: memref<1x128xf32, #tpu.memory_space<vmem>>, %arg8: memref<128x256xf32, #tpu.memory_space<vmem>>) attributes {dimension_semantics = [#tpu.dimension_semantics<parallel>], iteration_bounds = array<i64: 2>, scalar_prefetch = 0 : i64, scratch_operands = 0 : i64, tpu.core_type = #tpu.core_type<tc>, window_params = [{transform_indices = @transform_0, window_bounds = array<i64: 128, 56>}, {pipeline_mode = #tpu.pipeline_mode<synchronous>, transform_indices = @transform_1, window_bounds = array<i64: 56, 256>}, {transform_indices = @transform_2, window_bounds = array<i64: 128, 48>}, {pipeline_mode = #tpu.pipeline_mode<synchronous>, transform_indices = @transform_3, window_bounds = array<i64: 48, 128>}, {pipeline_mode = #tpu.pipeline_mode<synchronous>, transform_indices = @transform_4, window_bounds = array<i64: 128, 128>}, {pipeline_mode = #tpu.pipeline_mode<synchronous>, transform_indices = @transform_5, window_bounds = array<i64: 128, 128>}, {pipeline_mode = #tpu.pipeline_mode<synchronous>, transform_indices = @transform_6, window_bounds = array<i64: 1, 128>}, {transform_indices = @transform_7, window_bounds = array<i64: 128, 256>}]} {
    %c0 = arith.constant 0 : index
    %c0_0 = arith.constant 0 : index
    %0 = vector.load %arg1[%c0, %c0_0] : memref<128x56xf32, #tpu.memory_space<vmem>>, vector<128x56xf32>
    %c0_1 = arith.constant 0 : index
    %c0_2 = arith.constant 0 : index
    %1 = vector.load %arg2[%c0_1, %c0_2] : memref<56x256xf32, #tpu.memory_space<vmem>>, vector<56x256xf32>
    %cst = arith.constant dense<0.000000e+00> : vector<128x256xf32>
    %2 = tpu.matmul %0, %1, %cst {dimension_numbers = #tpu.dot_dimension_numbers<[1], [0], [0], [1], [0, 0, 1, 1], [], []>} : vector<128x56xf32>, vector<56x256xf32>, vector<128x256xf32> -> vector<128x256xf32>
    %3 = vector.extract_strided_slice %2 {offsets = [0, 0], sizes = [128, 128], strides = [1, 1]} : vector<128x256xf32> to vector<128x128xf32>
    %4 = vector.extract_strided_slice %2 {offsets = [0, 128], sizes = [128, 128], strides = [1, 1]} : vector<128x256xf32> to vector<128x128xf32>
    %c0_3 = arith.constant 0 : index
    %c0_4 = arith.constant 0 : index
    %5 = vector.load %arg3[%c0_3, %c0_4] : memref<128x48xbf16, #tpu.memory_space<vmem>>, vector<128x48xbf16>
    %c0_5 = arith.constant 0 : index
    %c0_6 = arith.constant 0 : index
    %6 = vector.load %arg4[%c0_5, %c0_6] : memref<48x128xbf16, #tpu.memory_space<vmem>>, vector<48x128xbf16>
    %cst_7 = arith.constant dense<0.000000e+00> : vector<128x128xf32>
    %7 = tpu.matmul %5, %6, %cst_7 {dimension_numbers = #tpu.dot_dimension_numbers<[1], [0], [0], [1], [0, 0, 1, 1], [], []>} : vector<128x48xbf16>, vector<48x128xbf16>, vector<128x128xf32> -> vector<128x128xf32>
    %8 = arith.truncf %7 : vector<128x128xf32> to vector<128x128xbf16>
    %c0_8 = arith.constant 0 : index
    %c0_9 = arith.constant 0 : index
    %9 = vector.load %arg5[%c0_8, %c0_9] : memref<128x128xbf16, #tpu.memory_space<vmem>>, vector<128x128xbf16>
    %cst_10 = arith.constant dense<0.000000e+00> : vector<128x128xf32>
    %10 = tpu.matmul %8, %9, %cst_10 {dimension_numbers = #tpu.dot_dimension_numbers<[1], [0], [0], [1], [0, 0, 1, 1], [], []>} : vector<128x128xbf16>, vector<128x128xbf16>, vector<128x128xf32> -> vector<128x128xf32>
    %11 = arith.truncf %3 : vector<128x128xf32> to vector<128x128xbf16>
    %c0_11 = arith.constant 0 : index
    %c0_12 = arith.constant 0 : index
    %12 = vector.load %arg6[%c0_11, %c0_12] : memref<128x128xbf16, #tpu.memory_space<vmem>>, vector<128x128xbf16>
    %cst_13 = arith.constant dense<0.000000e+00> : vector<128x128xf32>
    %13 = tpu.matmul %11, %12, %cst_13 {dimension_numbers = #tpu.dot_dimension_numbers<[1], [0], [0], [1], [0, 0, 1, 1], [], []>} : vector<128x128xbf16>, vector<128x128xbf16>, vector<128x128xf32> -> vector<128x128xf32>
    %c0_14 = arith.constant 0 : index
    %c0_15 = arith.constant 0 : index
    %14 = vector.load %arg7[%c0_14, %c0_15] : memref<1x128xf32, #tpu.memory_space<vmem>>, vector<1x128xf32>
    %15 = vector.broadcast %14 : vector<1x128xf32> to vector<128x128xf32>
    %16 = arith.addf %13, %15 : vector<128x128xf32>
    %17 = arith.addf %16, %10 : vector<128x128xf32>
    %18 = arith.negf %17 : vector<128x128xf32>
    %19 = math.exp %18 : vector<128x128xf32>
    %cst_16 = arith.constant 1.000000e+00 : f32
    %20 = vector.broadcast %cst_16 : f32 to vector<128x128xf32>
    %21 = arith.addf %20, %19 : vector<128x128xf32>
    %22 = arith.divf %20, %21 : vector<128x128xf32>
    %c0_17 = arith.constant 0 : index
    %c0_18 = arith.constant 0 : index
    %23 = vector.load %arg8[%c0_17, %c0_18] : memref<128x256xf32, #tpu.memory_space<vmem>>, vector<128x128xf32>
    tpu.vector_store %arg8[%c0_17, %c0_18], %3 {strides = array<i32>} : memref<128x256xf32, #tpu.memory_space<vmem>>, vector<128x128xf32>,
    %24 = arith.mulf %22, %4 : vector<128x128xf32>
    %c0_19 = arith.constant 0 : index
    %c128 = arith.constant 128 : index
    %25 = vector.load %arg8[%c0_19, %c128] : memref<128x256xf32, #tpu.memory_space<vmem>>, vector<128x128xf32>
    tpu.vector_store %arg8[%c0_19, %c128], %24 {strides = array<i32>} : memref<128x256xf32, #tpu.memory_space<vmem>>, vector<128x128xf32>,
    return
  }
  func.func @transform_0(%arg0: i32) -> (i32, i32) {
    %c0_i32 = arith.constant 0 : i32
    %c0_i32_0 = arith.constant 0 : i32
    return %arg0, %c0_i32 : i32, i32
  }
  func.func @transform_1(%arg0: i32) -> (i32, i32) {
    %c0_i32 = arith.constant 0 : i32
    %c0_i32_0 = arith.constant 0 : i32
    %c0_i32_1 = arith.constant 0 : i32
    return %c0_i32, %c0_i32_0 : i32, i32
  }
  func.func @transform_2(%arg0: i32) -> (i32, i32) {
    %c0_i32 = arith.constant 0 : i32
    %c0_i32_0 = arith.constant 0 : i32
    return %arg0, %c0_i32 : i32, i32
  }
  func.func @transform_3(%arg0: i32) -> (i32, i32) {
    %c0_i32 = arith.constant 0 : i32
    %c0_i32_0 = arith.constant 0 : i32
    %c0_i32_1 = arith.constant 0 : i32
    return %c0_i32, %c0_i32_0 : i32, i32
  }
  func.func @transform_4(%arg0: i32) -> (i32, i32) {
    %c0_i32 = arith.constant 0 : i32
    %c0_i32_0 = arith.constant 0 : i32
    %c0_i32_1 = arith.constant 0 : i32
    return %c0_i32, %c0_i32_0 : i32, i32
  }
  func.func @transform_5(%arg0: i32) -> (i32, i32) {
    %c0_i32 = arith.constant 0 : i32
    %c0_i32_0 = arith.constant 0 : i32
    %c0_i32_1 = arith.constant 0 : i32
    return %c0_i32, %c0_i32_0 : i32, i32
  }
  func.func @transform_6(%arg0: i32) -> (i32, i32) {
    %c0_i32 = arith.constant 0 : i32
    %c0_i32_0 = arith.constant 0 : i32
    %c0_i32_1 = arith.constant 0 : i32
    return %c0_i32, %c0_i32_0 : i32, i32
  }
  func.func @transform_7(%arg0: i32) -> (i32, i32) {
    %c0_i32 = arith.constant 0 : i32
    %c0_i32_0 = arith.constant 0 : i32
    return %arg0, %c0_i32 : i32, i32
  }
}

</mosaic_0001>

<bundles_post_ra>
// kernel: tpu_custom_call.1
= control target key start
LH: loop header
LB: loop body
LE: loop exit
PB: predicated region body
PF: predicated region fallthrough
CT: control target
= control target key end

     0   :  { %12 = vsyncpa [#allocation3], 0  ;;  %s2286_s0 = inlined_call_operand.vmem [shape: f32[256,56], index: 0, kind: input, shape index: {}]   ;;  %s2287_s1 = inlined_call_operand.vmem [shape: f32[56,256], index: 1, kind: input, shape index: {}]   ;;  %s2288_s2 = inlined_call_operand.vmem [shape: bf16[256,48], index: 2, kind: input, shape index: {}]   ;;  %s2289_s3 = inlined_call_operand.vmem [shape: bf16[48,128], index: 3, kind: input, shape index: {}]   ;;  %s2290_s4 = inlined_call_operand.vmem [shape: bf16[128,128], index: 4, kind: input, shape index: {}]   ;;  %s2291_s5 = inlined_call_operand.vmem [shape: bf16[128,128], index: 5, kind: input, shape index: {}]   ;;  %s2292_s6 = inlined_call_operand.vmem [shape: f32[1,128], index: 6, kind: input, shape index: {}]   ;;  %s2293_s7 = inlined_call_operand.hbm [shape: f32[256,256], index: 7, kind: output, shape index: {}]  }
   0x1   :  { %14 = vsyncpa [#allocation3 + $0x1], 0  ;;  %s1854_s24 = smov 0   ;;  %s1856_s25 = smov 0  }
   0x2   :  { %s1858_s26 = smov 0   ;;  %s1860_s27 = smov 0  }
   0x3 LB: > { %s1875_s28 = sadd.s32 4294967295, %s1808_s27   ;;  %s1339_s29 = sadd.s32 4294967294, %s1808_s27   ;;  %s1808_s27 = sphi %s1860_s27, %s2299_s27   ;;  %s1804_s26 = sphi %s1858_s26, %s2298_s26   ;;  %s1800_s25 = sphi %s1856_s25, %s2297_s25   ;;  %s1796_s24 = sphi %s1854_s24, %s2296_s24  }
   0x4   : > { %s1879_s30 = sadd.s32 1, %s1808_s27   ;;  %s184_s8 = sadd.s32 1, %s1804_s26 }
   0x5   : > { %s181_s9 = ssub.s32 %s1808_s27, %s1879_s30  ;;  %p194_p0 = scmp.ne.s32.totalorder %s1804_s26, %s1800_s25 }
   0x6   : > { %p182_p1 = scmp.eq.s32.totalorder %s181_s9, 0  ;;  %p195_p2 = scmp.eq.s32.totalorder %s1875_s28, 1 }
   0x7   : > { %p200_p3 = scmp.ne.s32.totalorder %s1800_s25, %s1796_s24  ;;  %p201_p4 = scmp.eq.s32.totalorder %s1339_s29, 1 }
   0x8   : > { %s1890_s10 = scalar_select %p182_p1, %s1804_s26, %s184_s8  }
   0x9   : > { %p1892_p5 = por %p195_p2, %p194_p0  ;;  %p1896_p6 = por %p201_p4, %p200_p3 }
   0xa   : > { %p1342_p7 = scmp.ge.s32.totalorder %s1808_s27, 1  ;;  %p252_p8 = scmp.lt.s32.totalorder %s1808_s27, 3 }
   0xc   : > { %p253_p9 = pnand %p1342_p7, %p252_p8 }
   0xd   : > { %v320_v0 = vld [vmem:[%s2287_s1 + $0x8] sm:$0xff] (!%p253_p9)  ;;  %v322_v1 = vld [vmem:[%s2287_s1 + $0x18] sm:$0xff] (!%p253_p9)  ;;  %s1344_s17 = sshll.u32 (!%p253_p9), %s1875_s28, 4  ;;  %v1655_v3 = vld [vmem:[%s2289_s3] sm:$0xff] (!%p253_p9)   ;;  %v1810_v8 = vmov (!%p253_p9), 0.0   ;;  %vm623_vm0 = vcmask (!%p253_p9), 392192  }
   0xe   : > { %256 = sbr.rel (%p253_p9) target bundleno = 566 (0x236), region = 48  ;;  %v1553_v2 = vpack.c.bf16 (!%p253_p9), %v322_v1, %v320_v0  ;;  %v319_v4 = vld [vmem:[%s2287_s1] sm:$0xff] (!%p253_p9)  ;;  %p290_p10 = scmp.lt.s32.totalorder (!%p253_p9), %s1344_s17, 31  ;;  %v321_v5 = vld [vmem:[%s2287_s1 + $0x10] sm:$0xff] (!%p253_p9)  ;;  %v324_v6 = vld [vmem:[%s2287_s1 + $0x28] sm:$0xff] (!%p253_p9)  ;;  %446 = vmatprep.mubr.f32.mxu0 (!%p253_p9), %v1810_v8  ;;  %1467 = vmatprep.subr.bf16.mxu1 (!%p253_p9), %v1655_v3  ;;  %vm333_vm1 = vcmask (!%p253_p9), 457728  }
   0xf   : > { %v326_v7 = vld [vmem:[%s2287_s1 + $0x38] sm:$0xff] (!%p253_p9)  ;;  %v1555_v9 = vpack.c.bf16 (!%p253_p9), %v321_v5, %v319_v4  ;;  %v1656_v11 = vld [vmem:[%s2289_s3 + $0x8] sm:$0xff] (!%p253_p9)   ;;  %1468 = vmatpush3.bf16.msra.mxu1 (!%p253_p9), %v1655_v3  ;;  %v323_v12 = vld [vmem:[%s2287_s1 + $0x20] sm:$0xff] (!%p253_p9)  ;;  %s286_s23 = sand.u32 (!%p253_p9), 1, %s1800_s25   ;;  %s1811_s19 = smov (!%p253_p9), [#allocation2]  }
  0x10   : > { %1554 = vmatprep.subr.bf16.mxu0 (!%p253_p9), %v1553_v2  ;;  %v1557_v10 = vpack.c.bf16 (!%p253_p9), %v326_v7, %v324_v6  ;;  %v325_v13 = vld [vmem:[%s2287_s1 + $0x30] sm:$0xff] (!%p253_p9)  ;;  %v328_v14 = vld [vmem:[%s2287_s1 + $0x48] sm:$0xff] (!%p253_p9)  ;;  %1469 = vmatprep.subr.bf16.mxu1 (!%p253_p9), %v1656_v11  ;;  %v330_v16 = vld [vmem:[%s2287_s1 + $0x58] sm:$0xff] (!%p253_p9)  ;;  %s1343_s29 = sshll.u32 (!%p253_p9), %s286_s23, 8  ;;  %s1750_s20 = sshll.u32 (!%p253_p9), %s1811_s19, 4  ;;  %s1751_s20 = int_to_ptr.vmem [resolvable:$false] %s1750_s20 }
  0x11   : > { %1556 = vmatpush1.bf16.msra.mxu0 (!%p253_p9), %v1555_v9  ;;  %v1559_v15 = vpack.c.bf16 (!%p253_p9), %v325_v13, %v323_v12  ;;  %v1561_v17 = vpack.c.bf16 (!%p253_p9), %v330_v16, %v328_v14  ;;  %v1657_v18 = vld [vmem:[%s2289_s3 + $0x10] sm:$0xff] (!%p253_p9)   ;;  %v327_v19 = vld [vmem:[%s2287_s1 + $0x40] sm:$0xff] (!%p253_p9)  ;;  %v332_v23 = vld [vmem:[%s2287_s1 + $0x68] sm:$0xff] (!%p253_p9) }
  0x12   : > { %1558 = vmatprep.subr.bf16.mxu0 (!%p253_p9), %v1557_v10  ;;  %v329_v20 = vld [vmem:[%s2287_s1 + $0x50] sm:$0xff] (!%p253_p9)  ;;  %v331_v26 = vld [vmem:[%s2287_s1 + $0x60] sm:$0xff] (!%p253_p9)  ;;  %v1667_v32 = vld [vmem:[%s2290_s4 + $0x8] sm:$0xff] (!%p253_p9)  }
  0x13   : > { %1470 = vmatpush3.bf16.msra.mxu1 (!%p253_p9), %v1656_v11  ;;  %v1563_v22 = vpack.c.bf16 (!%p253_p9), %v329_v20, %v327_v19  ;;  %v1666_v31 = vld [vmem:[%s2290_s4] sm:$0xff] (!%p253_p9)   ;;  %v1668_v36 = vld [vmem:[%s2290_s4 + $0x10] sm:$0xff] (!%p253_p9)   ;;  %v2005_v37 = vld [vmem:[%s2291_s5 + $0x8] sm:$0xff] (!%p253_p9)  }
  0x14   : > { %1471 = vmatprep.subr.bf16.mxu1 (!%p253_p9), %v1657_v18  ;;  %v1995_v34 = vld [vmem:[%s2291_s5] sm:$0xff] (!%p253_p9)   ;;  %v2017_v41 = vld [vmem:[%s2291_s5 + $0x10] sm:$0xff] (!%p253_p9)   ;;  %v1670_v42 = vld [vmem:[%s2290_s4 + $0x18] sm:$0xff] (!%p253_p9)  }
  0x15   : > { %s2301_s17 = smov (!%p290_p10, %s1344_s17), 31  ;;  %1560 = vmatpush1.bf16.msra.mxu0 %v1559_v15  ;;  %v2028_v43 = vld [vmem:[%s2291_s5 + $0x18] sm:$0xff]   ;;  %v1672_v44 = vld [vmem:[%s2290_s4 + $0x20] sm:$0xff]   ;;  %v1674_v47 = vld [vmem:[%s2290_s4 + $0x28] sm:$0xff]  }
  0x16   : > { %s1347_s8 = sshll.u32 %s2301_s17, 2  ;;  %s1345_s22 = sshll.u32 %s2301_s17, 3  ;;  %1562 = vmatprep.subr.bf16.mxu0 %v1561_v17  ;;  %v1676_v49 = vld [vmem:[%s2290_s4 + $0x30] sm:$0xff]   ;;  %v2084_v59 = vld [vmem:[%s2291_s5 + $0x20] sm:$0xff]   ;;  %v1678_v60 = vld [vmem:[%s2290_s4 + $0x38] sm:$0xff]  }
  0x17   : > { %s1955_s21 = scalar_lea.vmem %s2288_s2, %s1347_s8  ;;  %1472 = vmatpush3.bf16.msra.mxu1 %v1657_v18  ;;  %s1967_s13 = scalar_lea.vmem %s2286_s0, %s1345_s22  ;;  %v2094_v61 = vld [vmem:[%s2291_s5 + $0x28] sm:$0xff]   ;;  %v2102_v62 = vld [vmem:[%s2291_s5 + $0x30] sm:$0xff]   ;;  %v2109_v63 = vld [vmem:[%s2291_s5 + $0x38] sm:$0xff]  }
  0x18   : > { %v1658_v21 = vld [vmem:[%s1955_s21] sm:$0xff]   ;;  %v1659_v24 = vld [vmem:[%s1955_s21 + $0x8] sm:$0xff]   ;;  %v1660_v25 = vld [vmem:[%s1955_s21 + $0x10] sm:$0xff]   ;;  %1489 = vmatprep.subr.bf16.mxu1 %v1666_v31  ;;  %s1423_s17 = sshll.u32 %s1875_s28, 12  ;;  %s2245_s28 = scalar_lea.sflag [#allocation3], %s286_s23 }
  0x19   : > { %1473 = vmatprep.mubr.msk.bf16.mxu1 %vm623_vm0, %v1658_v21  ;;  %1564 = vmatpush1.bf16.msra.mxu0 %v1563_v22  ;;  %v303_v27 = vld [vmem:[%s1967_s13] sm:$0xff]  ;;  %v304_v28 = vld [vmem:[%s1967_s13 + $0x8] sm:$0xff]  ;;  %v1661_v29 = vld [vmem:[%s1955_s21 + $0x18] sm:$0xff]   ;;  %s2237_s16 = scalar_lea.hbm %s2293_s7, %s1423_s17  ;;  %s1752_s22 = scalar_lea.vmem %s1751_s20, 8192 }
  0x1a   : > { %394 = vmatprep.subr.mxu0 %v332_v23  ;;  %1474 = vmatmul.mubr.msk.bf16.vlgmr.msra.gmra.mrb[0].mxu1 %vm623_vm0, %v1659_v24  ;;  %v1662_v30 = vld [vmem:[%s1955_s21 + $0x20] sm:$0xff]   ;;  %v305_v33 = vld [vmem:[%s1967_s13 + $0x10] sm:$0xff]  ;;  %v306_v35 = vld [vmem:[%s1967_s13 + $0x18] sm:$0xff] }
  0x1b   : > { %1477 = vmatprep.mubr.msk.bf16.mxu1 %vm623_vm0, %v1660_v25  ;;  %1490 = vmatpush3.bf16.msra.mxu1 %v1666_v31  ;;  %v1663_v38 = vld [vmem:[%s1955_s21 + $0x28] sm:$0xff]   ;;  %v1664_v39 = vld [vmem:[%s1955_s21 + $0x30] sm:$0xff]   ;;  %v307_v40 = vld [vmem:[%s1967_s13 + $0x20] sm:$0xff] }
  0x1c   : > { %1491 = vmatprep.subr.bf16.mxu1 %v1667_v32  ;;  %v308_v45 = vld [vmem:[%s1967_s13 + $0x28] sm:$0xff]  ;;  %v1665_v46 = vld [vmem:[%s1955_s21 + $0x38] sm:$0xff]   ;;  %v309_v48 = vld [vmem:[%s1967_s13 + $0x30] sm:$0xff]  ;;  %s2116_s21 = scalar_lea.vmem [#allocation2], %s1343_s29 }
  0x1d   : > { %395 = vmatpush1.msra.mxu0 %v331_v26  ;;  %v310_v50 = vld [vmem:[%s1967_s13 + $0x38] sm:$0xff]  ;;  %v311_v51 = vld [vmem:[%s1967_s13 + $0x40] sm:$0xff]  ;;  %v312_v52 = vld [vmem:[%s1967_s13 + $0x48] sm:$0xff]  ;;  %s1265_s14 = sshll.u32 %s2116_s21, 4  ;;  %s2239_s14 = int_to_ptr.vmem [resolvable:$true] %s1265_s14 }
  0x1e   : > { %1348 = vmatmul.mubr.msk.f32.vlgmr.msra.gmra.mrb[0].mxu0 %vm333_vm1, %v303_v27  ;;  %1521 = vmatprep.subr.bf16.mxu0 %v1995_v34  ;;  %v313_v53 = vld [vmem:[%s1967_s13 + $0x50] sm:$0xff]  ;;  %v314_v54 = vld [vmem:[%s1967_s13 + $0x58] sm:$0xff]  ;;  %v315_v55 = vld [vmem:[%s1967_s13 + $0x60] sm:$0xff]  ;;  %s1746_s18 = scalar_lea.vmem %s2239_s14, 4096  ;;  %p1753_p0 = scmp.lt.s32.totalorder %s2239_s14, %s1751_s20 }
  0x1f   : > { %452 = vmatprep.mubr.f32.mxu0 %v1810_v8  ;;  %1522 = vmatpush3.bf16.msra.mxu0 %v1995_v34  ;;  %v316_v56 = vld [vmem:[%s1967_s13 + $0x68] sm:$0xff]  ;;  %v317_v57 = vld [vmem:[%s1967_s13 + $0x70] sm:$0xff]  ;;  %v318_v58 = vld [vmem:[%s1967_s13 + $0x78] sm:$0xff]  ;;  %p1747_p11 = scmp.ne.s32.totalorder %s2239_s14, %s1746_s18  ;;  %p1754_p1 = scmp.lt.s32.totalorder %s1752_s22, %s1746_s18 }
  0x20   : > { %1492 = vmatpush3.bf16.msra.mxu1 %v1667_v32  ;;  %1523 = vmatprep.subr.bf16.mxu0 %v2005_v37 }
  0x21   : > { %1493 = vmatprep.subr.bf16.mxu1 %v1668_v36  ;;  %p1748_p12 = pnand %p1747_p11, %p1892_p5  ;;  %p1755_p2 = por %p1754_p1, %p1753_p0 }
  0x22   : > { %1349 = vmatmul.mubr.msk.f32.gmra.mrb[2].mxu0 %vm333_vm1, %v304_v28  ;;  %1478 = vmatmul.mubr.msk.bf16.gmra.mrb[4].mxu1 %vm623_vm0, %v1661_v29 }
  0x23   : > { %458 = vmatprep.mubr.f32.mxu0 %v1810_v8  ;;  %1481 = vmatprep.mubr.msk.bf16.mxu1 %vm623_vm0, %v1662_v30  ;;  %p1749_p13 = pneg %p1748_p12 }
  0x24   : > { %1524 = vmatpush3.bf16.msra.mxu0 %v2005_v37  ;;  %1494 = vmatpush3.bf16.msra.mxu1 %v1668_v36 }
  0x25   : > { %1525 = vmatprep.subr.bf16.mxu0 %v2017_v41  ;;  %1495 = vmatprep.subr.bf16.mxu1 %v1670_v42  ;;  %p1756_p3 = pnand %p1755_p2, %p1749_p13 }
  0x26   : > { %1350 = vmatmul.mubr.msk.f32.gmra.mrb[4].mxu0 %vm333_vm1, %v305_v33 }
  0x27   : > { %464 = vmatprep.mubr.f32.mxu0 %v1810_v8 }
  0x28   : > { %1526 = vmatpush3.bf16.msra.mxu0 %v2017_v41  ;;  %1496 = vmatpush3.bf16.msra.mxu1 %v1670_v42 }
  0x29   : > { %1527 = vmatprep.subr.bf16.mxu0 %v2028_v43  ;;  %1497 = vmatprep.subr.bf16.mxu1 %v1672_v44 }
  0x2a   : > { %1351 = vmatmul.mubr.msk.f32.gmra.mrb[6].mxu0 %vm333_vm1, %v306_v35  ;;  %1482 = vmatmul.mubr.msk.bf16.gmra.mrb[8].mxu1 %vm623_vm0, %v1663_v38 }
  0x2b   : > { %470 = vmatprep.mubr.f32.mxu0 %v1810_v8  ;;  %1485 = vmatprep.mubr.msk.bf16.mxu1 %vm623_vm0, %v1664_v39 }
  0x2c   : > { %1528 = vmatpush3.bf16.msra.mxu0 %v2028_v43  ;;  %1498 = vmatpush3.bf16.msra.mxu1 %v1672_v44 }
  0x2d   : > { %1499 = vmatprep.subr.bf16.mxu1 %v1674_v47  ;;  %1529 = vmatprep.subr.bf16.mxu0 %v2084_v59 }
  0x2e   : > { %1352 = vmatmul.mubr.msk.f32.gmra.mrb[8].mxu0 %vm333_vm1, %v307_v40 }
  0x2f   : > { %476 = vmatprep.mubr.f32.mxu0 %v1810_v8 }
  0x30   : > { %1500 = vmatpush3.bf16.msra.mxu1 %v1674_v47  ;;  %1530 = vmatpush3.bf16.msra.mxu0 %v2084_v59 }
  0x31   : > { %1501 = vmatprep.subr.bf16.mxu1 %v1676_v49  ;;  %1531 = vmatprep.subr.bf16.mxu0 %v2094_v61 }
  0x32   : > { %1353 = vmatmul.mubr.msk.f32.gmra.mrb[10].mxu0 %vm333_vm1, %v308_v45  ;;  %1486 = vmatmul.mubr.msk.bf16.gmra.mrb[12].mxu1 %vm623_vm0, %v1665_v46 }
  0x33   : > { %482 = vmatprep.mubr.f32.mxu0 %v1810_v8 }
  0x34   : > { %1502 = vmatpush3.bf16.msra.mxu1 %v1676_v49  ;;  %1532 = vmatpush3.bf16.msra.mxu0 %v2094_v61 }
  0x35   : > { %1503 = vmatprep.subr.bf16.mxu1 %v1678_v60  ;;  %1533 = vmatprep.subr.bf16.mxu0 %v2102_v62 }
  0x36   : > { %1354 = vmatmul.mubr.msk.f32.gmra.mrb[12].mxu0 %vm333_vm1, %v309_v48 }
  0x37   : > { %488 = vmatprep.mubr.f32.mxu0 %v1810_v8 }
  0x38   : > { %1504 = vmatpush3.bf16.msra.mxu1 %v1678_v60  ;;  %1534 = vmatpush3.bf16.msra.mxu0 %v2102_v62 }
  0x39   : > { %1565 = vmatprep.subr.bf16.mxu1 %v1995_v34  ;;  %1535 = vmatprep.subr.bf16.mxu0 %v2109_v63 }
  0x3a   : > { %1355 = vmatmul.mubr.msk.f32.gmra.mrb[14].mxu0 %vm333_vm1, %v310_v50 }
  0x3b   : > { %494 = vmatprep.mubr.f32.mxu0 %v1810_v8 }
  0x3c   : > { %1536 = vmatpush3.bf16.msra.mxu0 %v2109_v63 }
  0x3e   : > { %1356 = vmatmul.mubr.msk.f32.gmra.mrb[16].mxu0 %vm333_vm1, %v311_v51 }
  0x3f   : > { %500 = vmatprep.mubr.f32.mxu0 %v1810_v8 }
  0x42   : > { %1357 = vmatmul.mubr.msk.f32.gmra.mrb[18].mxu0 %vm333_vm1, %v312_v52 }
  0x43   : > { %506 = vmatprep.mubr.f32.mxu0 %v1810_v8 }
  0x46   : > { %1358 = vmatmul.mubr.msk.f32.gmra.mrb[20].mxu0 %vm333_vm1, %v313_v53 }
  0x47   : > { %512 = vmatprep.mubr.f32.mxu0 %v1810_v8 }
  0x4a   : > { %1359 = vmatmul.mubr.msk.f32.gmra.mrb[22].mxu0 %vm333_vm1, %v314_v54 }
  0x4b   : > { %518 = vmatprep.mubr.f32.mxu0 %v1810_v8 }
  0x4e   : > { %1360 = vmatmul.mubr.msk.f32.gmra.mrb[24].mxu0 %vm333_vm1, %v315_v55 }
  0x4f   : > { %524 = vmatprep.mubr.f32.mxu0 %v1810_v8 }
  0x52   : > { %1361 = vmatmul.mubr.msk.f32.gmra.mrb[26].mxu0 %vm333_vm1, %v316_v56 }
  0x53   : > { %530 = vmatprep.mubr.f32.mxu0 %v1810_v8 }
  0x56   : > { %1362 = vmatmul.mubr.msk.f32.gmra.mrb[28].mxu0 %vm333_vm1, %v317_v57 }
  0x57   : > { %536 = vmatprep.mubr.f32.mxu0 %v1810_v8 }
  0x5a   : > { %1363 = vmatmul.mubr.msk.f32.gmra.mrb[30].mxu0 %vm333_vm1, %v318_v58 }
  0xed   : > { %v1475_v0 = vpop.f32.mrb[0].mxu1 }
  0xee   : > { %v682_v1 = vpop.f32.mrb[1].mxu1 }
  0xef   : > { %v1476_v2 = vpop.f32.mrb[2].mxu1 }
  0xf0   : > { %v746_v4 = vpack.c.bf16 %v1476_v2, %v1475_v0  ;;  %v685_v5 = vpop.f32.mrb[3].mxu1 }
  0xf1   : > { %v448_v3 = vpop.f32.mrb[0].mxu0  ;;  %v745_v7 = vpack.c.bf16 %v685_v5, %v682_v1 }
  0xf2   : > { %1202 = vst [vmem:[%s2116_s21] sm:$0xff] %v448_v3  ;;  %v2119_v6 = vpop.f32.mrb[1].mxu0 }
  0xf3   : > { %1505 = vmatprep.mubr.bf16.mxu1 %v745_v7 }
  0xf4   : > { %1506 = vmatmul.mubr.bf16.vlgmr.msra.gmra.mrb[16].mxu1 %v746_v4  ;;  %v2184_v4 = vld [vmem:[%s2292_s6] ss:$0 sm:$0xff] }
  0xf5   : > { %v454_v8 = vpop.f32.mrb[2].mxu0  ;;  %v1479_v11 = vpop.f32.mrb[4].mxu1  ;;  %1573 = vmatpush3.bf16.msra.mxu1 %v1995_v34 }
  0xf6   : > { %v914_v9 = vpack.c.bf16 %v454_v8, %v448_v3  ;;  %1203 = vst [vmem:[%s2116_s21 + $0x10] sm:$0xff] %v454_v8  ;;  %v2122_v10 = vpop.f32.mrb[3].mxu0  ;;  %v698_v12 = vpop.f32.mrb[5].mxu1  ;;  %1566 = vmatprep.subr.bf16.mxu1 %v2005_v37 }
  0xf7   : > { %v1480_v13 = vpop.f32.mrb[6].mxu1 }
  0xf8   : > { %1537 = vmatprep.mubr.bf16.mxu0 %v914_v9  ;;  %v748_v15 = vpack.c.bf16 %v1480_v13, %v1479_v11  ;;  %v701_v16 = vpop.f32.mrb[7].mxu1 }
  0xf9   : > { %v460_v14 = vpop.f32.mrb[4].mxu0  ;;  %v747_v18 = vpack.c.bf16 %v701_v16, %v698_v12  ;;  %1574 = vmatpush3.bf16.msra.mxu1 %v2005_v37 }
  0xfa   : > { %1204 = vst [vmem:[%s2116_s21 + $0x20] sm:$0xff] %v460_v14  ;;  %v2127_v17 = vpop.f32.mrb[5].mxu0  ;;  %1567 = vmatprep.subr.bf16.mxu1 %v2017_v41 }
  0xfb   : > { %1509 = vmatprep.mubr.bf16.mxu1 %v747_v18 }
  0xfc   : > { %1510 = vmatmul.mubr.bf16.gmra.mrb[20].mxu1 %v748_v15 }
  0xfd   : > { %v466_v19 = vpop.f32.mrb[6].mxu0  ;;  %v1483_v22 = vpop.f32.mrb[8].mxu1  ;;  %1575 = vmatpush3.bf16.msra.mxu1 %v2017_v41 }
  0xfe   : > { %v915_v20 = vpack.c.bf16 %v466_v19, %v460_v14  ;;  %1205 = vst [vmem:[%s2116_s21 + $0x30] sm:$0xff] %v466_v19  ;;  %v2132_v21 = vpop.f32.mrb[7].mxu0  ;;  %v714_v23 = vpop.f32.mrb[9].mxu1  ;;  %1568 = vmatprep.subr.bf16.mxu1 %v2028_v43 }
  0xff   : > { %v1484_v24 = vpop.f32.mrb[10].mxu1 }
 0x100   : > { %1538 = vmatmul.mubr.bf16.vlgmr.msra.gmra.mrb[32].mxu0 %v915_v20  ;;  %v750_v26 = vpack.c.bf16 %v1484_v24, %v1483_v22  ;;  %v717_v27 = vpop.f32.mrb[11].mxu1 }
 0x101   : > { %v472_v25 = vpop.f32.mrb[8].mxu0  ;;  %v749_v29 = vpack.c.bf16 %v717_v27, %v714_v23  ;;  %1576 = vmatpush3.bf16.msra.mxu1 %v2028_v43 }
 0x102   : > { %1206 = vst [vmem:[%s2116_s21 + $0x40] sm:$0xff] %v472_v25  ;;  %v2137_v28 = vpop.f32.mrb[9].mxu0  ;;  %1569 = vmatprep.subr.bf16.mxu1 %v2084_v59 }
 0x103   : > { %1513 = vmatprep.mubr.bf16.mxu1 %v749_v29 }
 0x104   : > { %1514 = vmatmul.mubr.bf16.gmra.mrb[24].mxu1 %v750_v26 }
 0x105   : > { %v478_v30 = vpop.f32.mrb[10].mxu0  ;;  %v1487_v33 = vpop.f32.mrb[12].mxu1  ;;  %1577 = vmatpush3.bf16.msra.mxu1 %v2084_v59 }
 0x106   : > { %v916_v31 = vpack.c.bf16 %v478_v30, %v472_v25  ;;  %1207 = vst [vmem:[%s2116_s21 + $0x50] sm:$0xff] %v478_v30  ;;  %v2142_v32 = vpop.f32.mrb[11].mxu0  ;;  %v730_v34 = vpop.f32.mrb[13].mxu1  ;;  %1570 = vmatprep.subr.bf16.mxu1 %v2094_v61 }
 0x107   : > { %v1488_v35 = vpop.f32.mrb[14].mxu1 }
 0x108   : > { %v752_v37 = vpack.c.bf16 %v1488_v35, %v1487_v33  ;;  %v733_v38 = vpop.f32.mrb[15].mxu1 }
 0x109   : > { %v484_v36 = vpop.f32.mrb[12].mxu0  ;;  %v751_v40 = vpack.c.bf16 %v733_v38, %v730_v34  ;;  %1578 = vmatpush3.bf16.msra.mxu1 %v2094_v61 }
 0x10a   : > { %1208 = vst [vmem:[%s2116_s21 + $0x60] sm:$0xff] %v484_v36  ;;  %v2147_v39 = vpop.f32.mrb[13].mxu0  ;;  %1571 = vmatprep.subr.bf16.mxu1 %v2102_v62 }
 0x10b   : > { %1517 = vmatprep.mubr.bf16.mxu1 %v751_v40 }
 0x10c   : > { %1518 = vmatmul.mubr.bf16.gmra.mrb[28].mxu1 %v752_v37 }
 0x10d   : > { %v490_v41 = vpop.f32.mrb[14].mxu0  ;;  %1579 = vmatpush3.bf16.msra.mxu1 %v2102_v62  ;;  %1541 = vmatprep.mubr.bf16.mxu1 %v916_v31 }
 0x10e   : > { %v917_v42 = vpack.c.bf16 %v490_v41, %v484_v36  ;;  %1209 = vst [vmem:[%s2116_s21 + $0x70] sm:$0xff] %v490_v41  ;;  %v2152_v43 = vpop.f32.mrb[15].mxu0  ;;  %1572 = vmatprep.subr.bf16.mxu1 %v2109_v63 }
 0x111   : > { %v496_v44 = vpop.f32.mrb[16].mxu0  ;;  %1580 = vmatpush3.bf16.msra.mxu1 %v2109_v63 }
 0x112   : > { %1210 = vst [vmem:[%s2116_s21 + $0x80] sm:$0xff] %v496_v44  ;;  %v2157_v45 = vpop.f32.mrb[17].mxu0 }
 0x114   : > { %1542 = vmatmul.mubr.bf16.vlgmr.msra.gmra.mrb[20].mxu1 %v917_v42 }
 0x115   : > { %v502_v46 = vpop.f32.mrb[18].mxu0 }
 0x116   : > { %v918_v47 = vpack.c.bf16 %v502_v46, %v496_v44  ;;  %1211 = vst [vmem:[%s2116_s21 + $0x90] sm:$0xff] %v502_v46  ;;  %v2161_v48 = vpop.f32.mrb[19].mxu0 }
 0x118   : > { %1545 = vmatprep.mubr.bf16.mxu1 %v918_v47 }
 0x119   : > { %v508_v49 = vpop.f32.mrb[20].mxu0 }
 0x11a   : > { %1212 = vst [vmem:[%s2116_s21 + $0xa0] sm:$0xff] %v508_v49  ;;  %v2164_v50 = vpop.f32.mrb[21].mxu0 }
 0x11d   : > { %v514_v51 = vpop.f32.mrb[22].mxu0 }
 0x11e   : > { %v919_v52 = vpack.c.bf16 %v514_v51, %v508_v49  ;;  %1213 = vst [vmem:[%s2116_s21 + $0xb0] sm:$0xff] %v514_v51  ;;  %v2167_v53 = vpop.f32.mrb[23].mxu0 }
 0x120   : > { %1546 = vmatmul.mubr.bf16.gmra.mrb[24].mxu1 %v919_v52 }
 0x121   : > { %v520_v54 = vpop.f32.mrb[24].mxu0 }
 0x122   : > { %1214 = vst [vmem:[%s2116_s21 + $0xc0] sm:$0xff] %v520_v54  ;;  %v2170_v55 = vpop.f32.mrb[25].mxu0 }
 0x125   : > { %v526_v56 = vpop.f32.mrb[26].mxu0 }
 0x126   : > { %v920_v57 = vpack.c.bf16 %v526_v56, %v520_v54  ;;  %1215 = vst [vmem:[%s2116_s21 + $0xd0] sm:$0xff] %v526_v56  ;;  %v2173_v58 = vpop.f32.mrb[27].mxu0 }
 0x128   : > { %1549 = vmatprep.mubr.bf16.mxu1 %v920_v57 }
 0x129   : > { %v532_v59 = vpop.f32.mrb[28].mxu0 }
 0x12a   : > { %1216 = vst [vmem:[%s2116_s21 + $0xe0] sm:$0xff] %v532_v59  ;;  %v2176_v60 = vpop.f32.mrb[29].mxu0 }
 0x12d   : > { %v538_v61 = vpop.f32.mrb[30].mxu0 }
 0x12e   : > { %v921_v62 = vpack.c.bf16 %v538_v61, %v532_v59  ;;  %1217 = vst [vmem:[%s2116_s21 + $0xf0] sm:$0xff] %v538_v61  ;;  %v2179_v63 = vpop.f32.mrb[31].mxu0 }
 0x130   : > { %1550 = vmatmul.mubr.bf16.gmra.mrb[28].mxu1 %v921_v62 }
 0x1c7   : > { %v1507_v0 = vpop.f32.mrb[16].mxu1 }
 0x1c8   : > { %v851_v1 = vpop.f32.mrb[17].mxu1 }
 0x1c9   : > { %v1508_v2 = vpop.f32.mrb[18].mxu1 }
 0x1ca   : > { %v854_v3 = vpop.f32.mrb[19].mxu1  ;;  %v1585_v7 = vadd.f32 %v1508_v2, %v2184_v4 }
 0x1cb   : > { %v1587_v11 = vadd.f32 %v2184_v4, %v854_v3 }
 0x1d3   : > { %v1539_v5 = vpop.f32.mrb[32].mxu0 }
 0x1d4   : > { %v1581_v8 = vadd.f32 %v1539_v5, %v1507_v0  ;;  %v1027_v9 = vpop.f32.mrb[33].mxu0 }
 0x1d5   : > { %v1583_v12 = vadd.f32 %v1027_v9, %v851_v1  ;;  %v1540_v13 = vpop.f32.mrb[34].mxu0 }
 0x1d6   : > { %v1582_v14 = vadd.f32 %v1581_v8, %v2184_v4  ;;  %v1586_v15 = vadd.f32 %v1585_v7, %v1540_v13  ;;  %v1030_v16 = vpop.f32.mrb[35].mxu0 }
 0x1d7   : > { %v1584_v18 = vadd.f32 %v1583_v12, %v2184_v4  ;;  %v1588_v19 = vadd.f32 %v1587_v11, %v1030_v16 }
 0x1d8   : > { %v1402_v20 = vmul.f32 -1.442695, %v1582_v14  ;;  %v1403_v22 = vmul.f32 -1.442695, %v1586_v15 }
 0x1d9   : > { %v1400_v23 = vmul.f32 -1.442695, %v1584_v18  ;;  %v1401_v24 = vmul.f32 -1.442695, %v1588_v19 }
 0x1da   : > { %1682 = vpow2.f32 %v1402_v20 }
 0x1db   : > { %1684 = vpow2.f32 %v1400_v23 }
 0x1dc   : > { %1686 = vpow2.f32 %v1403_v22 }
 0x1dd   : > { %1688 = vpow2.f32 %v1401_v24 }
 0x1e4   : > { %v1683_v25 = vpop.eup %1682 }
 0x1e5   : > { %v1685_v26 = vpop.eup %1684  ;;  %v1156_v27 = vadd.f32 1.0, %v1683_v25 }
 0x1e6   : > { %v1687_v29 = vpop.eup %1686  ;;  %v1154_v30 = vadd.f32 1.0, %v1685_v26 }
 0x1e7   : > { %v1689_v31 = vpop.eup %1688  ;;  %1690 = vrcp.f32 %v1156_v27  ;;  %v1157_v33 = vadd.f32 1.0, %v1687_v29  ;;  %v1543_v35 = vpop.f32.mrb[20].mxu1 }
 0x1e8   : > { %1692 = vrcp.f32 %v1154_v30  ;;  %v1155_v34 = vadd.f32 1.0, %v1689_v31  ;;  %v1052_v36 = vadd.f32 %v1543_v35, %v2184_v4  ;;  %v1043_v37 = vpop.f32.mrb[21].mxu1 }
 0x1e9   : > { %1694 = vrcp.f32 %v1157_v33  ;;  %v1044_v38 = vadd.f32 %v2184_v4, %v1043_v37  ;;  %v1544_v40 = vpop.f32.mrb[22].mxu1 }
 0x1ea   : > { %1696 = vrcp.f32 %v1155_v34  ;;  %v1406_v41 = vmul.f32 -1.442695, %v1052_v36  ;;  %v1055_v42 = vadd.f32 %v1544_v40, %v2184_v4  ;;  %v1046_v44 = vpop.f32.mrb[23].mxu1 }
 0x1eb   : > { %v1404_v46 = vmul.f32 -1.442695, %v1044_v38  ;;  %v1047_v47 = vadd.f32 %v2184_v4, %v1046_v44 }
 0x1ec   : > { %1698 = vpow2.f32 %v1406_v41  ;;  %v1407_v49 = vmul.f32 -1.442695, %v1055_v42 }
 0x1ed   : > { %1700 = vpow2.f32 %v1404_v46  ;;  %v1405_v51 = vmul.f32 -1.442695, %v1047_v47 }
 0x1ee   : > { %1702 = vpow2.f32 %v1407_v49 }
 0x1ef   : > { %1704 = vpow2.f32 %v1405_v51 }
 0x1f1   : > { %v1691_v52 = vpop.eup %1690 }
 0x1f2   : > { %v1693_v54 = vpop.eup %1692  ;;  %v1220_v56 = vmul.f32 %v1691_v52, %v2127_v17 }
 0x1f3   : > { %v1695_v57 = vpop.eup %1694  ;;  %v1218_v59 = vmul.f32 %v1693_v54, %v2119_v6  ;;  %v1547_v61 = vpop.f32.mrb[24].mxu1 }
 0x1f4   : > { %v1697_v62 = vpop.eup %1696  ;;  %1236 = vst [vmem:[%s2116_s21 + $0x28] sm:$0xff] %v1220_v56  ;;  %v1221_v0 = vmul.f32 %v1695_v57, %v2132_v21  ;;  %v1068_v1 = vadd.f32 %v1547_v61, %v2184_v4  ;;  %v1059_v2 = vpop.f32.mrb[25].mxu1 }
 0x1f5   : > { %1234 = vst [vmem:[%s2116_s21 + $0x8] sm:$0xff] %v1218_v59  ;;  %v1219_v3 = vmul.f32 %v1697_v62, %v2122_v10  ;;  %v1060_v5 = vadd.f32 %v2184_v4, %v1059_v2  ;;  %v1548_v7 = vpop.f32.mrb[26].mxu1 }
 0x1f6   : > { %1237 = vst [vmem:[%s2116_s21 + $0x38] sm:$0xff] %v1221_v0  ;;  %v1410_v17 = vmul.f32 -1.442695, %v1068_v1  ;;  %v1071_v8 = vadd.f32 %v1548_v7, %v2184_v4  ;;  %v1062_v6 = vpop.f32.mrb[27].mxu1  ;;  %v1699_v9 = vpop.eup %1698 }
 0x1f7   : > { %1235 = vst [vmem:[%s2116_s21 + $0x18] sm:$0xff] %v1219_v3  ;;  %v1408_v11 = vmul.f32 -1.442695, %v1060_v5  ;;  %v1063_v12 = vadd.f32 %v2184_v4, %v1062_v6  ;;  %v1701_v21 = vpop.eup %1700  ;;  %v1160_v13 = vadd.f32 1.0, %v1699_v9 }
 0x1f8   : > { %1706 = vpow2.f32 %v1410_v17  ;;  %v1703_v14 = vpop.eup %1702  ;;  %v1158_v15 = vadd.f32 1.0, %v1701_v21  ;;  %v1411_v18 = vmul.f32 -1.442695, %v1071_v8 }
 0x1f9   : > { %1708 = vpow2.f32 %v1408_v11  ;;  %v1705_v10 = vpop.eup %1704  ;;  %v1161_v16 = vadd.f32 1.0, %v1703_v14  ;;  %v1409_v20 = vmul.f32 -1.442695, %v1063_v12 }
 0x1fa   : > { %1710 = vrcp.f32 %v1160_v13  ;;  %v1159_v19 = vadd.f32 1.0, %v1705_v10 }
 0x1fb   : > { %1712 = vrcp.f32 %v1158_v15 }
 0x1fc   : > { %1714 = vrcp.f32 %v1161_v16 }
 0x1fd   : > { %1716 = vrcp.f32 %v1159_v19 }
 0x1fe   : > { %1718 = vpow2.f32 %v1411_v18 }
 0x1ff   : > { %1720 = vpow2.f32 %v1409_v20 }
 0x202   : > { %v1707_v22 = vpop.eup %1706 }
 0x203   : > { %v1709_v23 = vpop.eup %1708  ;;  %v1164_v24 = vadd.f32 1.0, %v1707_v22  ;;  %v1551_v25 = vpop.f32.mrb[28].mxu1 }
 0x204   : > { %v1711_v26 = vpop.eup %1710  ;;  %v1162_v27 = vadd.f32 1.0, %v1709_v23  ;;  %v1084_v29 = vadd.f32 %v1551_v25, %v2184_v4  ;;  %v1075_v30 = vpop.f32.mrb[29].mxu1 }
 0x205   : > { %v1713_v31 = vpop.eup %1712  ;;  %v1224_v33 = vmul.f32 %v1711_v26, %v2147_v39  ;;  %1722 = vrcp.f32 %v1164_v24  ;;  %v1076_v34 = vadd.f32 %v2184_v4, %v1075_v30  ;;  %v1552_v35 = vpop.f32.mrb[30].mxu1 }
 0x206   : > { %v1715_v36 = vpop.eup %1714  ;;  %v1222_v37 = vmul.f32 %v1713_v31, %v2137_v28  ;;  %1724 = vrcp.f32 %v1162_v27  ;;  %v1414_v38 = vmul.f32 -1.442695, %v1084_v29  ;;  %v1087_v40 = vadd.f32 %v1552_v35, %v2184_v4  ;;  %v1078_v41 = vpop.f32.mrb[31].mxu1 }
 0x207   : > { %v1717_v42 = vpop.eup %1716  ;;  %1240 = vst [vmem:[%s2116_s21 + $0x68] sm:$0xff] %v1224_v33  ;;  %v1225_v44 = vmul.f32 %v1715_v36, %v2152_v43  ;;  %v1412_v39 = vmul.f32 -1.442695, %v1076_v34  ;;  %v1079_v46 = vadd.f32 %v2184_v4, %v1078_v41 }
 0x208   : > { %v1719_v47 = vpop.eup %1718  ;;  %1238 = vst [vmem:[%s2116_s21 + $0x48] sm:$0xff] %v1222_v37  ;;  %v1223_v49 = vmul.f32 %v1717_v42, %v2142_v32  ;;  %1726 = vpow2.f32 %v1414_v38  ;;  %v1415_v28 = vmul.f32 -1.442695, %v1087_v40 }
 0x209   : > { %v1721_v51 = vpop.eup %1720  ;;  %1241 = vst [vmem:[%s2116_s21 + $0x78] sm:$0xff] %v1225_v44  ;;  %v1165_v52 = vadd.f32 1.0, %v1719_v47  ;;  %1728 = vpow2.f32 %v1412_v39  ;;  %v1413_v54 = vmul.f32 -1.442695, %v1079_v46 }
 0x20a   : > { %1239 = vst [vmem:[%s2116_s21 + $0x58] sm:$0xff] %v1223_v49  ;;  %v1163_v56 = vadd.f32 1.0, %v1721_v51  ;;  %1730 = vpow2.f32 %v1415_v28 }
 0x20b   : > { %1732 = vrcp.f32 %v1165_v52 }
 0x20c   : > { %1734 = vrcp.f32 %v1163_v56 }
 0x20d   : > { %1736 = vpow2.f32 %v1413_v54 }
 0x20f   : > { %v1723_v43 = vpop.eup %1722 }
 0x210   : > { %v1725_v4 = vpop.eup %1724  ;;  %v1228_v57 = vmul.f32 %v1723_v43, %v2164_v50 }
 0x211   : > { %v1226_v32 = vmul.f32 %v1725_v4, %v2157_v45 }
 0x212   : > { %v1727_v59 = vpop.eup %1726  ;;  %1244 = vst [vmem:[%s2116_s21 + $0xa8] sm:$0xff] %v1228_v57 }
 0x213   : > { %v1729_v61 = vpop.eup %1728  ;;  %1242 = vst [vmem:[%s2116_s21 + $0x88] sm:$0xff] %v1226_v32  ;;  %v1168_v62 = vadd.f32 1.0, %v1727_v59 }
 0x214   : > { %v1731_v0 = vpop.eup %1730  ;;  %v1166_v1 = vadd.f32 1.0, %v1729_v61 }
 0x215   : > { %v1733_v2 = vpop.eup %1732  ;;  %1738 = vrcp.f32 %v1168_v62  ;;  %v1169_v3 = vadd.f32 1.0, %v1731_v0 }
 0x216   : > { %v1735_v5 = vpop.eup %1734  ;;  %v1229_v7 = vmul.f32 %v1733_v2, %v2167_v53  ;;  %1740 = vrcp.f32 %v1166_v1 }
 0x217   : > { %v1737_v45 = vpop.eup %1736  ;;  %v1227_v50 = vmul.f32 %v1735_v5, %v2161_v48  ;;  %1742 = vrcp.f32 %v1169_v3 }
 0x218   : > { %1245 = vst [vmem:[%s2116_s21 + $0xb8] sm:$0xff] %v1229_v7  ;;  %v1167_v17 = vadd.f32 1.0, %v1737_v45 }
 0x219   : > { %1243 = vst [vmem:[%s2116_s21 + $0x98] sm:$0xff] %v1227_v50 }
 0x21a   : > { %1744 = vrcp.f32 %v1167_v17 }
 0x21f   : > { %v1739_v8 = vpop.eup %1738 }
 0x220   : > { %v1741_v6 = vpop.eup %1740  ;;  %v1232_v9 = vmul.f32 %v1739_v8, %v2176_v60 }
 0x221   : > { %v1743_v11 = vpop.eup %1742  ;;  %v1230_v53 = vmul.f32 %v1741_v6, %v2170_v55 }
 0x222   : > { %1248 = vst [vmem:[%s2116_s21 + $0xe8] sm:$0xff] %v1232_v9  ;;  %v1233_v48 = vmul.f32 %v1743_v11, %v2179_v63 }
 0x223   : > { %1246 = vst [vmem:[%s2116_s21 + $0xc8] sm:$0xff] %v1230_v53 }
 0x224   : > { %v1745_v12 = vpop.eup %1744  ;;  %1249 = vst [vmem:[%s2116_s21 + $0xf8] sm:$0xff] %v1233_v48 }
 0x225   : > { %v1231_v55 = vmul.f32 %v1745_v12, %v2173_v58 }
 0x227   : > { %1247 = vst [vmem:[%s2116_s21 + $0xd8] sm:$0xff] %v1231_v55 }
 0x228   : > { %1759 = shalt.err (!%p1756_p3)
}
 0x229   : > { %s1760_s23 = scalar_lea.hbm %s2237_s16, 4096  ;;  %s1764_s8 = scalar_lea.hbm %s2293_s7, 8192 }
 0x22a   : > { %p1761_p4 = scmp.ne.s32.totalorder %s2237_s16, %s1760_s23  ;;  %p1765_p9 = scmp.lt.u32.totalorder %s2237_s16, %s2293_s7 }
 0x22b   : > { %p1766_p10 = scmp.lt.u32.totalorder %s1764_s8, %s1760_s23  ;;  %p1768_p12 = scmp.lt.u32.totalorder %s1760_s23, %s2237_s16 }
 0x22c   : > { %p1762_p7 = pnand %p1761_p4, %p1892_p5 }
 0x22d   : > { %p1767_p11 = por %p1766_p10, %p1765_p9 }
 0x22e   : > { %p1763_p8 = pneg %p1762_p7 }
 0x22f   : > { %p1769_p13 = por %p1768_p12, %p1767_p11 }
 0x231   : > { %p1770_p0 = pnand %p1769_p13, %p1763_p8 }
 0x233   : > { %1773 = shalt.err (!%p1770_p0)
}
 0x234   : > { %s1812_s15 = smov 256   ;;  %s1813_s13 = smov 16  }
 0x235   : > { %1613 = dma.vmem_to_hbm [thread:$0]  (%p1892_p5), %s2239_s14, 4096, %s2237_s16, %s2245_s28, %s1812_s15, %s1812_s15, %s1813_s13  }
 0x236 PF: > { %p1619_p1 = scmp.ge.s32.totalorder %s1808_s27, 2  ;;  %s1280_s18 = sand.u32 1, %s1796_s24  }
 0x237   : > { %s1281_s19 = scalar_lea.sflag [#allocation3], %s1280_s18 }
 0x238   : > { %p1616_p2 = pnand %p1619_p1, %p1896_p6 }
 0x23a   : > { %1791 = dma.done.wait (!%p1616_p2), %s1281_s19, 4096  }
 0x23b   : > { %1793 = vsyncadd (!%p1616_p2), %s1281_s19, 4294963200  ;;  %p17_p3 = scmp.ge.s32.totalorder %s1879_s30, 4   ;;  %s2296_s24 = smov %s1800_s25 }
 0x23c   : > { %s2297_s25 = smov %s1804_s26  ;;  %s2298_s26 = smov %s1890_s10 }
 0x23d   : > { %s2299_s27 = smov %s1879_s30  ;;  %19 = sbr.rel (!%p17_p3) target bundleno = 3 (0x3), region = 86 }
 0x244   :  { %1286 = vsyncpa [#allocation3], 1 }
 0x245   :  { %1288 = vsyncpa [#allocation3 + $0x1], 1 }

</bundles_post_ra>
